<compile_context>
chip_gen: v5e
topology: v5e:2x2
jax: 0.10.0
libtpu: 0.0.40
codegen_flags: <defaults>
</compile_context>

<pallas_src>
import functools

import jax
import jax.numpy as jnp
import numpy as np
from jax.experimental import pallas as pl
from jax.experimental.pallas import tpu as pltpu


def _temporal_attention_kernel(xp_ref, w_ref, be_ref, ve_ref, o_ref, *, T, N, B_blk):
    # xp_ref: (B_blk*T, N*C)   x permuted to (b, t, n, c) and flattened (row = b*T + t)
    # w_ref : (N*C, 2*N)       folded weights: [:, :N] = U_1*U_2 fold, [:, N:] = U_3 fold
    # be_ref: (T, T)           b_e
    # ve_ref: (T, T)           V_e
    # o_ref : (B_blk, T, T)    softmax(E, dim=1)
    f32 = jnp.float32

    # One MXU matmul produces both `lhs` and `rhs` for every (batch, timestep) row.
    y = jnp.dot(xp_ref[...], w_ref[...], preferred_element_type=f32)      # (B_blk*T, 2N)
    lhs = y[:, :N].reshape(B_blk, T, N)       # lhs[b, t1, n]
    rhsT = y[:, N:].reshape(B_blk, T, N)      # rhsT[b, t2, n] == rhs[b, n, t2]

    # product[b, t1, t2] = sum_n lhs[b, t1, n] * rhs[b, n, t2]
    # Single batched dot_general over the batch dim (no per-batch Python loop, no scratch).
    prod = jax.lax.dot_general(
        lhs, rhsT,
        dimension_numbers=(((2,), (2,)), ((0,), (0,))),
        preferred_element_type=f32)                                        # (B_blk, T, T)

    sig = jax.nn.sigmoid(prod + be_ref[...][None, :, :])                   # (B_blk, T, T)

    # E[b, t1, t2] = sum_u V_e[t1, u] * sig[b, u, t2]
    # V_e broadcast over the batch dim -> plain batched matmul, result already (b, t1, t2).
    ve_b = jnp.broadcast_to(ve_ref[...][None, :, :], (B_blk, T, T))
    e = jax.lax.dot_general(
        ve_b, sig,
        dimension_numbers=(((2,), (1,)), ((0,), (0,))),
        preferred_element_type=f32)                                        # (B_blk, T, T)

    # softmax over t1 (== torch softmax(E, dim=1))
    m = jnp.max(e, axis=1, keepdims=True)
    ex = jnp.exp(e - m)
    denom = jnp.sum(ex, axis=1, keepdims=True)
    o_ref[...] = (ex * pl.reciprocal(denom, approx=True)).astype(o_ref.dtype)


def _pick_block_b(B, T, requested):
    """Generation-aware batch-block size (rows of the main matmul == B_blk*T)."""
    if requested is not None:
        return max(1, int(requested))
    kind = ""
    try:
        kind = jax.devices()[0].device_kind.lower()
    except Exception:
        pass
    mxu_rows = 128 if "v5" in kind else 256          # v5e MXU is 128-wide; v6e/v7x are 256-wide
    bb = max(8, ((mxu_rows // max(T, 1)) // 8) * 8)  # multiple of 8 -> legal sublane blocking
    if "v7" in kind and B > 8:
        # v7x has 2 TensorCores per chip: keep the grid >= 2 steps when B allows so the
        # "parallel" grid axis can be sharded across both cores.
        half = ((B + 1) // 2 + 7) // 8 * 8
        bb = min(bb, max(8, half))
    return bb


@functools.partial(jax.jit, static_argnames=("block_b", "matmul_dtype"))
def temporal_attention(x, U_1, U_2, U_3, b_e, V_e, *, block_b=None, matmul_dtype=None):
    """x: (B, N, C, T) in the native PyTorch layout. Returns softmax(E, dim=1): (B, T, T).

    matmul_dtype: optionally jnp.bfloat16 to halve HBM bytes / double MXU rate of the
    folded matmul at scale (accumulation stays f32); default keeps everything f32.
    """
    B, N, C, T = x.shape
    f32 = jnp.float32
    x = x.astype(f32)
    U_1, U_2, U_3 = U_1.astype(f32), U_2.astype(f32), U_3.astype(f32)
    b_e = b_e.reshape(T, T).astype(f32)
    V_e = V_e.astype(f32)
    NC = N * C

    # ---- tiny folded weights (O(N^2*C), lives inside jit; no huge dense fold) ----
    # A_lhs[n*C+c, k] = U_1[n] * U_2[c, k]      -> lhs[b,t,k] = sum_{n,c} x[b,n,c,t]*U_1[n]*U_2[c,k]
    # A_rhs[n*C+c, k] = delta(n, k) * U_3[c]    -> rhs[b,k,t] = sum_c   x[b,k,c,t]*U_3[c]
    A_lhs = (U_1[:, None, None] * U_2[None, :, :]).reshape(NC, N)
    A_rhs = (jnp.eye(N, dtype=f32)[:, None, :] * U_3[None, :, None]).reshape(NC, N)
    Wc = jnp.concatenate([A_lhs, A_rhs], axis=1)                           # (N*C, 2N)

    # ---- batch blocking ----
    bb = _pick_block_b(B, T, block_b)
    if B <= bb:
        B_blk, B_pad = B, B                       # single step: full-extent blocks
    else:
        B_blk = bb
        B_pad = pl.cdiv(B, B_blk) * B_blk

    # x (B,N,C,T) -> (B,T,N,C) -> (B*T, N*C): absorbs torch's permute(0,3,2,1).
    xp = jnp.transpose(x, (0, 3, 1, 2)).reshape(B, T * NC)
    if B_pad != B:
        xp = jnp.pad(xp, ((0, B_pad - B), (0, 0)))
    xp = xp.reshape(B_pad * T, NC)

    if matmul_dtype is not None:
        xp = xp.astype(matmul_dtype)
        Wc = Wc.astype(matmul_dtype)

    grid = (B_pad // B_blk,)
    kernel = functools.partial(_temporal_attention_kernel, T=T, N=N, B_blk=B_blk)

    # ---- explicit VMEM budget: resident weights + double-buffered x/out blocks ----
    def _padded(rows, cols, itemsize):
        return ((rows + 7) // 8 * 8) * ((cols + 127) // 128 * 128) * itemsize

    x_item = jnp.dtype(xp.dtype).itemsize
    vmem_bytes = (2 * _padded(B_blk * T, NC, x_item)       # x blocks (double-buffered)
                  + 2 * _padded(B_blk * T, T, 4)           # out blocks (over-estimate)
                  + 2 * _padded(NC, 2 * N, x_item)         # folded weight
                  + 4 * _padded(T, T, 4)                   # b_e, V_e
                  + (2 << 20))                             # margin
    vmem_bytes = int(min(max(vmem_bytes, 32 << 20), 64 << 20))

    out_padded = pl.pallas_call(
        kernel,
        out_shape=jax.ShapeDtypeStruct((B_pad, T, T), f32),
        grid_spec=pltpu.PrefetchScalarGridSpec(
            num_scalar_prefetch=0,
            grid=grid,
            in_specs=[
                pl.BlockSpec((B_blk * T, NC), lambda g: (g, 0)),   # x block (permuted, flattened)
                pl.BlockSpec((NC, 2 * N), lambda g: (0, 0)),       # folded weights (resident)
                pl.BlockSpec((T, T), lambda g: (0, 0)),            # b_e (resident)
                pl.BlockSpec((T, T), lambda g: (0, 0)),            # V_e (resident)
            ],
            out_specs=pl.BlockSpec((B_blk, T, T), lambda g: (g, 0, 0)),
        ),
        compiler_params=pltpu.CompilerParams(
            dimension_semantics=("parallel",),
            vmem_limit_bytes=vmem_bytes),
    )(xp, Wc, b_e, V_e)

    return out_padded[:B]


def reference(x, U_1, U_2, U_3, b_e, V_e):
    """Pure-JAX mirror of the PyTorch forward for validation."""
    xp = jnp.transpose(x, (0, 3, 2, 1))                                  # (B,T,C,N)
    _lsh = jnp.einsum('btcn,n->btc', xp, U_1)
    lhs = jnp.einsum('btc,cn->btn', _lsh, U_2)
    rhs = jnp.einsum('c,bnct->bnt', U_3, x)
    product = jnp.einsum('btn,bnk->btk', lhs, rhs)
    E = jnp.einsum('tu,buk->btk', V_e, jax.nn.sigmoid(product + b_e))
    return jax.nn.softmax(E, axis=1)


if __name__ == "__main__":
    # Shapes consistent with the module: B=2, N(vertices)=16, C(features)=4, T(timesteps)=8
    B, N, C, T = 2, 16, 4, 8
    key = jax.random.PRNGKey(0)
    kx, k1, k2, k3, kb, kv = jax.random.split(key, 6)

    x = jax.random.normal(kx, (B, N, C, T), dtype=jnp.float32)   # native PyTorch layout (B, N, C, T)
    # Parameters initialized exactly as the module does on first forward: torch.randn
    U_1 = jax.random.normal(k1, (N,), dtype=jnp.float32)
    U_2 = jax.random.normal(k2, (C, N), dtype=jnp.float32)
    U_3 = jax.random.normal(k3, (C,), dtype=jnp.float32)
    b_e = jax.random.normal(kb, (1, T, T), dtype=jnp.float32)
    V_e = jax.random.normal(kv, (T, T), dtype=jnp.float32)

    out = jax.block_until_ready(temporal_attention(x, U_1, U_2, U_3, b_e, V_e))
    ref = jax.block_until_ready(reference(x, U_1, U_2, U_3, b_e, V_e))
    # tolerance accounts for the approx (EUP) reciprocal in the softmax epilogue
    np.testing.assert_allclose(np.asarray(out), np.asarray(ref), rtol=2e-3, atol=2e-3)

    # Also exercise the multi-step (blocked + padded) grid path.
    B2 = 18
    kx2 = jax.random.fold_in(key, 7)
    x2 = jax.random.normal(kx2, (B2, N, C, T), dtype=jnp.float32)
    out2 = jax.block_until_ready(
        temporal_attention(x2, U_1, U_2, U_3, b_e, V_e, block_b=8))
    ref2 = jax.block_until_ready(reference(x2, U_1, U_2, U_3, b_e, V_e))
    np.testing.assert_allclose(np.asarray(out2), np.asarray(ref2), rtol=2e-3, atol=2e-3)

    print("KERNEL_OK")
</pallas_src>

<mosaic_0001>
module attributes {stable_mosaic.version = 11 : i64} {
  func.func @_temporal_attention_kernel(%arg0: i32, %arg1: memref<16x64xf32, #tpu.memory_space<vmem>>, %arg2: memref<64x32xf32, #tpu.memory_space<vmem>>, %arg3: memref<8x8xf32, #tpu.memory_space<vmem>>, %arg4: memref<8x8xf32, #tpu.memory_space<vmem>>, %arg5: memref<2x8x8xf32, #tpu.memory_space<vmem>>) attributes {dimension_semantics = [#tpu.dimension_semantics<parallel>], iteration_bounds = array<i64: 1>, scalar_prefetch = 0 : i64, scratch_operands = 0 : i64, tpu.core_type = #tpu.core_type<tc>, window_params = [{transform_indices = @transform_0, window_bounds = array<i64: 16, 64>}, {pipeline_mode = #tpu.pipeline_mode<synchronous>, transform_indices = @transform_1, window_bounds = array<i64: 64, 32>}, {pipeline_mode = #tpu.pipeline_mode<synchronous>, transform_indices = @transform_2, window_bounds = array<i64: 8, 8>}, {pipeline_mode = #tpu.pipeline_mode<synchronous>, transform_indices = @transform_3, window_bounds = array<i64: 8, 8>}, {transform_indices = @transform_4, window_bounds = array<i64: 2, 8, 8>}]} {
    %c0 = arith.constant 0 : index
    %c0_0 = arith.constant 0 : index
    %0 = vector.load %arg1[%c0, %c0_0] : memref<16x64xf32, #tpu.memory_space<vmem>>, vector<16x64xf32>
    %c0_1 = arith.constant 0 : index
    %c0_2 = arith.constant 0 : index
    %1 = vector.load %arg2[%c0_1, %c0_2] : memref<64x32xf32, #tpu.memory_space<vmem>>, vector<64x32xf32>
    %cst = arith.constant dense<0.000000e+00> : vector<16x32xf32>
    %2 = tpu.matmul %0, %1, %cst {dimension_numbers = #tpu.dot_dimension_numbers<[1], [0], [0], [1], [0, 0, 1, 1], [], []>} : vector<16x64xf32>, vector<64x32xf32>, vector<16x32xf32> -> vector<16x32xf32>
    %3 = vector.extract_strided_slice %2 {offsets = [0, 0], sizes = [16, 16], strides = [1, 1]} : vector<16x32xf32> to vector<16x16xf32>
    %4 = vector.shape_cast %3 : vector<16x16xf32> to vector<2x8x16xf32>
    %5 = vector.extract_strided_slice %2 {offsets = [0, 16], sizes = [16, 16], strides = [1, 1]} : vector<16x32xf32> to vector<16x16xf32>
    %6 = vector.shape_cast %5 : vector<16x16xf32> to vector<2x8x16xf32>
    %cst_3 = arith.constant dense<0.000000e+00> : vector<2x8x8xf32>
    %7 = tpu.matmul %4, %6, %cst_3 {dimension_numbers = #tpu.dot_dimension_numbers<[2], [2], [1], [1], [0, 0, 0, 1, 1, 1], [0], [0]>} : vector<2x8x16xf32>, vector<2x8x16xf32>, vector<2x8x8xf32> -> vector<2x8x8xf32>
    %c0_4 = arith.constant 0 : index
    %c0_5 = arith.constant 0 : index
    %8 = vector.load %arg3[%c0_4, %c0_5] : memref<8x8xf32, #tpu.memory_space<vmem>>, vector<8x8xf32>
    %9 = vector.shape_cast %8 : vector<8x8xf32> to vector<1x8x8xf32>
    %10 = vector.broadcast %9 : vector<1x8x8xf32> to vector<2x8x8xf32>
    %11 = arith.addf %7, %10 : vector<2x8x8xf32>
    %12 = arith.negf %11 : vector<2x8x8xf32>
    %13 = math.exp %12 : vector<2x8x8xf32>
    %cst_6 = arith.constant 1.000000e+00 : f32
    %14 = vector.broadcast %cst_6 : f32 to vector<2x8x8xf32>
    %15 = arith.addf %14, %13 : vector<2x8x8xf32>
    %16 = arith.divf %14, %15 : vector<2x8x8xf32>
    %c0_7 = arith.constant 0 : index
    %c0_8 = arith.constant 0 : index
    %17 = vector.load %arg4[%c0_7, %c0_8] : memref<8x8xf32, #tpu.memory_space<vmem>>, vector<8x8xf32>
    %18 = vector.shape_cast %17 : vector<8x8xf32> to vector<1x8x8xf32>
    %19 = vector.shape_cast %18 : vector<1x8x8xf32> to vector<1x8x8xf32>
    %20 = vector.broadcast %19 : vector<1x8x8xf32> to vector<2x8x8xf32>
    %cst_9 = arith.constant dense<0.000000e+00> : vector<2x8x8xf32>
    %21 = tpu.matmul %20, %16, %cst_9 {dimension_numbers = #tpu.dot_dimension_numbers<[2], [1], [1], [2], [0, 0, 0, 1, 1, 2], [0], [0]>} : vector<2x8x8xf32>, vector<2x8x8xf32>, vector<2x8x8xf32> -> vector<2x8x8xf32>
    %cst_10 = arith.constant dense<0xFF800000> : vector<2x8xf32>
    %22 = vector.multi_reduction <maximumf>, %21, %cst_10 [1] : vector<2x8x8xf32> to vector<2x8xf32>
    %23 = vector.shape_cast %22 : vector<2x8xf32> to vector<2x1x8xf32>
    %24 = vector.broadcast %23 : vector<2x1x8xf32> to vector<2x8x8xf32>
    %25 = arith.subf %21, %24 : vector<2x8x8xf32>
    %26 = math.exp %25 : vector<2x8x8xf32>
    %cst_11 = arith.constant dense<0.000000e+00> : vector<2x8xf32>
    %27 = vector.multi_reduction <add>, %26, %cst_11 [1] : vector<2x8x8xf32> to vector<2x8xf32>
    %28 = vector.shape_cast %27 : vector<2x8xf32> to vector<2x1x8xf32>
    %29 = tpu.reciprocal %28 {approx = true} : vector<2x1x8xf32> -> vector<2x1x8xf32>
    %30 = vector.broadcast %29 : vector<2x1x8xf32> to vector<2x8x8xf32>
    %31 = arith.mulf %26, %30 : vector<2x8x8xf32>
    %c0_12 = arith.constant 0 : index
    %c0_13 = arith.constant 0 : index
    %c0_14 = arith.constant 0 : index
    %32 = vector.load %arg5[%c0_12, %c0_13, %c0_14] : memref<2x8x8xf32, #tpu.memory_space<vmem>>, vector<2x8x8xf32>
    tpu.vector_store %arg5[%c0_12, %c0_13, %c0_14], %31 {strides = array<i32>} : memref<2x8x8xf32, #tpu.memory_space<vmem>>, vector<2x8x8xf32>,
    return
  }
  func.func @transform_0(%arg0: i32) -> (i32, i32) {
    %c0_i32 = arith.constant 0 : i32
    %c0_i32_0 = arith.constant 0 : i32
    return %arg0, %c0_i32 : i32, i32
  }
  func.func @transform_1(%arg0: i32) -> (i32, i32) {
    %c0_i32 = arith.constant 0 : i32
    %c0_i32_0 = arith.constant 0 : i32
    %c0_i32_1 = arith.constant 0 : i32
    return %c0_i32, %c0_i32_0 : i32, i32
  }
  func.func @transform_2(%arg0: i32) -> (i32, i32) {
    %c0_i32 = arith.constant 0 : i32
    %c0_i32_0 = arith.constant 0 : i32
    %c0_i32_1 = arith.constant 0 : i32
    return %c0_i32, %c0_i32_0 : i32, i32
  }
  func.func @transform_3(%arg0: i32) -> (i32, i32) {
    %c0_i32 = arith.constant 0 : i32
    %c0_i32_0 = arith.constant 0 : i32
    %c0_i32_1 = arith.constant 0 : i32
    return %c0_i32, %c0_i32_0 : i32, i32
  }
  func.func @transform_4(%arg0: i32) -> (i32, i32, i32) {
    %c0_i32 = arith.constant 0 : i32
    %c0_i32_0 = arith.constant 0 : i32
    %c0_i32_1 = arith.constant 0 : i32
    return %arg0, %c0_i32, %c0_i32_0 : i32, i32, i32
  }
}

</mosaic_0001>

<bundles_post_ra>
// kernel: temporal_attention.1
= control target key start
LH: loop header
LB: loop body
LE: loop exit
PB: predicated region body
PF: predicated region fallthrough
CT: control target
= control target key end

     0   :  { %s387_s0 = inlined_call_operand.vmem [shape: f32[16,64], index: 0, kind: input, shape index: {}]   ;;  %s388_s1 = inlined_call_operand.vmem [shape: f32[64,32], index: 1, kind: input, shape index: {}]   ;;  %s389_s2 = inlined_call_operand.vmem [shape: f32[8,8], index: 2, kind: input, shape index: {}]   ;;  %s390_s3 = inlined_call_operand.vmem [shape: f32[8,8], index: 3, kind: input, shape index: {}]   ;;  %s391_s4 = inlined_call_operand.hbm [shape: f32[2,8,8], index: 4, kind: output, shape index: {}]  }
   0x1   :  { %v27_v0 = vld [vmem:[%s388_s1 + $0x38] sm:$0xff]  ;;  %v26_v1 = vld [vmem:[%s388_s1 + $0x30] sm:$0xff]  ;;  %v25_v2 = vld [vmem:[%s388_s1 + $0x28] sm:$0xff] }
   0x2   :  { %43 = vmatpush.msra.mxu0 %v27_v0 }
   0x4   :  { %44 = vmatpush.msra.mxu0 %v26_v1 }
   0x5   :  { %9 = vsyncpa [#allocation3], 0  ;;  %v24_v3 = vld [vmem:[%s388_s1 + $0x20] sm:$0xff]  ;;  %v23_v4 = vld [vmem:[%s388_s1 + $0x18] sm:$0xff]  ;;  %vm28_vm0 = vcmask 523264   ;;  %s311_s9 = smov 112  }
   0x6   :  { %45 = vmatpush.msra.mxu0 %v25_v2  ;;  %v22_v5 = vld [vmem:[%s388_s1 + $0x10] sm:$0xff]  ;;  %v21_v6 = vld [vmem:[%s388_s1 + $0x8] sm:$0xff]  ;;  %v20_v7 = vld [vmem:[%s388_s1] sm:$0xff]  ;;  %vm62_vm1 = vcmask 130048   ;;  %vm153_vm6 = vcmask 64512   ;;  %s243_s14 = sshll.u32 %s391_s4, 4  ;;  %s244_s14 = int_to_ptr.hbm [resolvable:$true] %s243_s14 }
   0x7   :  { %v18_v8 = vld [vmem:[%s387_s0] sm:$0xff]  ;;  %v19_v9 = vld [vmem:[%s387_s0 + $0x8] sm:$0xff]  ;;  %s313_s15 = smov 128   ;;  %s314_s16 = smov 8  }
   0x8   :  { %46 = vmatpush.msra.mxu0 %v24_v3  ;;  %v58_v14 = vld [vmem:[%s389_s2] sm:$0xff] }
   0x9   :  { %v152_v34 = vld [vmem:[%s390_s3] sm:$0xff]  ;;  %s312_s3 = smov [#allocation2]  }
   0xa   :  { %47 = vmatpush.msra.mxu0 %v23_v4  ;;  %s241_s11 = sshll.u32 %s312_s3, 4  ;;  %s242_s11 = int_to_ptr.vmem [resolvable:$true] %s241_s11 }
   0xc   :  { %48 = vmatpush.msra.mxu0 %v22_v5 }
   0xe   :  { %49 = vmatpush.msra.mxu0 %v21_v6 }
  0x10   :  { %50 = vmatpush.msra.mxu0 %v20_v7 }
  0x11   :  { %255 = vmatmul.msk.f32.vlgmr.msra.gmra.mxu0 %vm28_vm0, %v18_v8 }
  0x19   :  { %256 = vmatmul.msk.f32.gmra.mxu0 %vm28_vm0, %v19_v9 }
  0x8e   :  { %v52_v10 = vpop.f32.mrf.mxu0 }
  0x8f   :  { %60 = vrot.lane.b32.xlu0 %v52_v10, %s311_s9 }
  0x96   :  { %v55_v11 = vpop.f32.mrf.mxu0 }
  0x97   :  { %88 = vrot.lane.b32.xlu0 %v55_v11, %s311_s9 }
 0x101   :  { %v61_v12 = vpop.permute.xlu0 %60 }
 0x102   :  { %257 = vmatpush.xpose.msk.msra.mxu1 %vm62_vm1, %v61_v12 }
 0x105   :  { %258 = vmatmul.msk.f32.vlgmr.msra.gmra.mxu1 %vm62_vm1, %v52_v10 }
 0x109   :  { %v89_v13 = vpop.permute.xlu0 %88 }
 0x10a   :  { %259 = vmatpush.xpose.msk.msra.mxu2 %vm62_vm1, %v89_v13 }
 0x10d   :  { %260 = vmatmul.msk.f32.vlgmr.msra.gmra.mxu2 %vm62_vm1, %v55_v11 }
 0x182   :  { %v84_v15 = vpop.f32.mrf.mxu1 }
 0x183   :  { %v85_v16 = vadd.f32 %v84_v15, %v58_v14 }
 0x185   :  { %v261_v17 = vmul.f32 -1.442695, %v85_v16 }
 0x187   :  { %269 = vpow2.f32 %v261_v17 }
 0x18d   :  { %v270_v18 = vpop.eup %269 }
 0x18e   :  { %v120_v19 = vadd.f32 1.0, %v270_v18 }
 0x190   :  { %271 = vrcp.f32 %v120_v19  ;;  %v111_v20 = vpop.f32.mrf.mxu2  ;;  %v133_v26 = vand.u32 2147483648, %v120_v19  ;;  %v131_v29 = vand.u32 2147483647, %v120_v19  ;;  %vm127_vm3 = vweird.f32 %v120_v19 }
 0x191   :  { %v112_v21 = vadd.f32 %v111_v20, %v58_v14 }
 0x192   :  { %v134_v32 = vor.u32 1.1754944e-38, %v133_v26  ;;  %vm132_vm5 = vcmp.eq.f32.partialorder %v131_v29, 8.507059e+37 }
 0x193   :  { %v262_v22 = vmul.f32 -1.442695, %v112_v21 }
 0x195   :  { %273 = vpow2.f32 %v262_v22 }
 0x196   :  { %v272_v23 = vpop.eup %271 }
 0x197   :  { %v123_v24 = vmul.f32 %v272_v23, %v120_v19  ;;  %vm128_vm2 = vweird.f32 %v272_v23 }
 0x198   :  { %vm129_vm4 = vmor %vm127_vm3, %vm128_vm2 }
 0x199   :  { %v124_v25 = vsub.f32 1.0, %v123_v24 }
 0x19b   :  { %v274_v27 = vpop.eup %273  ;;  %v125_v28 = vmul.f32 %v272_v23, %v124_v25 }
 0x19c   :  { %v121_v30 = vadd.f32 1.0, %v274_v27 }
 0x19d   :  { %v126_v31 = vadd.f32 %v272_v23, %v125_v28 }
 0x19e   :  { %275 = vrcp.f32 %v121_v30  ;;  %v148_v39 = vand.u32 2147483648, %v121_v30  ;;  %v146_v41 = vand.u32 2147483647, %v121_v30  ;;  %vm142_vm8 = vweird.f32 %v121_v30 }
 0x19f   :  { %v130_v33 = vsel %vm129_vm4, %v272_v23, %v126_v31 }
 0x1a0   :  { %v135_v35 = vsel %vm132_vm5, %v134_v32, %v130_v33  ;;  %v149_v43 = vor.u32 1.1754944e-38, %v148_v39  ;;  %vm147_vm10 = vcmp.eq.f32.partialorder %v146_v41, 8.507059e+37 }
 0x1a1   :  { %172 = vmatpush.msra.mxu3 %v135_v35 }
 0x1a2   :  { %263 = vmatmul.msk.f32.vlgmr.msra.gmra.mxu3 %vm153_vm6, %v152_v34 }
 0x1a4   :  { %v276_v36 = vpop.eup %275 }
 0x1a5   :  { %v138_v37 = vmul.f32 %v276_v36, %v121_v30  ;;  %vm143_vm7 = vweird.f32 %v276_v36 }
 0x1a6   :  { %vm144_vm9 = vmor %vm142_vm8, %vm143_vm7 }
 0x1a7   :  { %v139_v38 = vsub.f32 1.0, %v138_v37 }
 0x1a9   :  { %v140_v40 = vmul.f32 %v276_v36, %v139_v38 }
 0x1ab   :  { %v141_v42 = vadd.f32 %v276_v36, %v140_v40 }
 0x1ad   :  { %v145_v44 = vsel %vm144_vm9, %v276_v36, %v141_v42 }
 0x1ae   :  { %v150_v45 = vsel %vm147_vm10, %v149_v43, %v145_v44 }
 0x1af   :  { %192 = vmatpush.msrb.mxu3 %v150_v45 }
 0x1b0   :  { %264 = vmatmul.msk.f32.vlgmr.msrb.gmra.mxu3 %vm153_vm6, %v152_v34 }
 0x225   :  { %v174_v46 = vpop.f32.mrf.mxu3 }
 0x226   :  { %v197_v47 = vsel %vm153_vm6, %v174_v46, -inf }
 0x227   :  { %v198_v48 = vrot.slane %v197_v47, 4 }
 0x229   :  { %v199_v49 = vmax.f32 %v197_v47, %v198_v48 }
 0x22b   :  { %v200_v50 = vrot.slane %v199_v49, 2 }
 0x22d   :  { %v201_v51 = vmax.f32 %v199_v49, %v200_v50 }
 0x22f   :  { %v202_v52 = vrot.slane %v201_v51, 1 }
 0x231   :  { %v203_v53 = vmax.f32 %v201_v51, %v202_v52 }
 0x233   :  { %v211_v54 = vsub.f32 %v174_v46, %v203_v53  ;;  %v194_v55 = vpop.f32.mrf.mxu3 }
 0x234   :  { %v204_v56 = vsel %vm153_vm6, %v194_v55, -inf }
 0x235   :  { %v213_v57 = vmul.f32 1.442695, %v211_v54  ;;  %v205_v58 = vrot.slane %v204_v56, 4 }
 0x237   :  { %277 = vpow2.f32 %v213_v57  ;;  %v206_v59 = vmax.f32 %v204_v56, %v205_v58 }
 0x239   :  { %v207_v60 = vrot.slane %v206_v59, 2 }
 0x23b   :  { %v208_v61 = vmax.f32 %v206_v59, %v207_v60 }
 0x23d   :  { %v278_v62 = vpop.eup %277  ;;  %v209_v63 = vrot.slane %v208_v61, 1 }
 0x23e   :  { %v217_v0 = vsel %vm153_vm6, %v278_v62, 0.0 }
 0x23f   :  { %v218_v1 = vrot.slane %v217_v0, 4  ;;  %v210_v2 = vmax.f32 %v208_v61, %v209_v63 }
 0x241   :  { %v219_v3 = vadd.f32 %v218_v1, %v217_v0  ;;  %v212_v4 = vsub.f32 %v194_v55, %v210_v2 }
 0x243   :  { %v220_v5 = vrot.slane %v219_v3, 2  ;;  %v215_v6 = vmul.f32 1.442695, %v212_v4 }
 0x245   :  { %v221_v7 = vadd.f32 %v220_v5, %v219_v3  ;;  %279 = vpow2.f32 %v215_v6 }
 0x247   :  { %v222_v8 = vrot.slane %v221_v7, 1 }
 0x249   :  { %v223_v9 = vadd.f32 %v222_v8, %v221_v7 }
 0x24b   :  { %v280_v10 = vpop.eup %279  ;;  %281 = vrcp.f32 %v223_v9 }
 0x24c   :  { %v224_v11 = vsel %vm153_vm6, %v280_v10, 0.0 }
 0x24d   :  { %v225_v12 = vrot.slane %v224_v11, 4 }
 0x24f   :  { %v226_v13 = vadd.f32 %v225_v12, %v224_v11 }
 0x251   :  { %v282_v14 = vpop.eup %281  ;;  %v227_v15 = vrot.slane %v226_v13, 2 }
 0x252   :  { %v233_v16 = vmul.f32 %v282_v14, %v278_v62 }
 0x253   :  { %v228_v17 = vadd.f32 %v227_v15, %v226_v13 }
 0x254   :  { %235 = vst.msk [vmem:[#allocation2] sm:$0xff] %vm153_vm6, %v233_v16 }
 0x255   :  { %v229_v18 = vrot.slane %v228_v17, 1 }
 0x257   :  { %v230_v19 = vadd.f32 %v229_v18, %v228_v17 }
 0x259   :  { %283 = vrcp.f32 %v230_v19 }
 0x25f   :  { %v284_v20 = vpop.eup %283 }
 0x260   :  { %v234_v21 = vmul.f32 %v284_v20, %v280_v10 }
 0x262   :  { %236 = vst.msk [vmem:[#allocation2 + $0x8] sm:$0xff] %vm153_vm6, %v234_v21 }
 0x263   :  { %249 = dma.vmem_to_hbm [thread:$0]  %s242_s11, 256, %s244_s14, [#allocation3], %s313_s15, %s313_s15, %s314_s16  }
 0x264   :  { %309 = dma.done.wait [#allocation3], 256  }
 0x265   :  { %310 = vsyncadd [#allocation3], 4294967040 }
 0x266   :  { %254 = vsyncpa [#allocation3], 1 }

</bundles_post_ra>
